<compile_context>
chip_gen: v6e
topology: v6e:2x2x1
jax: 0.10.0
libtpu: 0.0.40
codegen_flags: <defaults>
</compile_context>

<pallas_src>
import functools

import jax
import jax.numpy as jnp
from jax.experimental import pallas as pl
from jax.experimental.pallas import tpu as pltpu

_EPS = 1e-8  # torch.nn.CosineSimilarity default eps


def _vmem_limit_bytes():
    """Generation-aware scoped-VMEM limit (v5e/v6e: 128 MiB phys, v7x: 64 MiB)."""
    try:
        cap = int(pltpu.get_tpu_info().vmem_capacity_bytes)
    except Exception:  # conservative fallback
        cap = 64 * 1024 * 1024
    return int(min(cap * 3 // 4, 100 * 1024 * 1024))


def _supcon_kernel(x_ref, y_ref, w_ref, out_pos_ref, out_neg_ref,
                   acc_pos_ref, acc_neg_ref, *, margin):
    # x_ref / y_ref : (T, D) VMEM, native dtype (full, unpadded feature axis)
    # w_ref         : (T, 1) VMEM f32 signed weights (+1 pos, -1 neg, 0 pad)
    # out_*_ref     : (8, 128) VMEM f32 per-core partial sums (written once)
    # acc_*_ref     : (T, 1) VMEM f32 scratch accumulators
    t = pl.program_id(1)

    @pl.when(t == 0)
    def _init():
        acc_pos_ref[...] = jnp.zeros_like(acc_pos_ref)
        acc_neg_ref[...] = jnp.zeros_like(acc_neg_ref)

    # bf16 stays bf16 (bf16 VPU on v6e/v7x, MXU accumulates in f32); other
    # dtypes compute in f32.
    cdt = jnp.bfloat16 if x_ref.dtype == jnp.bfloat16 else jnp.float32
    x = x_ref[...].astype(cdt)                               # (T, D)
    y = y_ref[...].astype(cdt)

    # Row-wise reductions over the feature axis on the (otherwise idle) MXU:
    #   sum(p, axis=-1) == p @ ones((D, 128)), take lane 0.
    ones = jnp.ones((x.shape[1], 128), dtype=cdt)
    hi = jax.lax.Precision.HIGHEST
    dot = jnp.dot(x * y, ones, precision=hi,
                  preferred_element_type=jnp.float32)[:, :1]  # (T, 1)
    sx = jnp.dot(x * x, ones, precision=hi,
                 preferred_element_type=jnp.float32)[:, :1]
    sy = jnp.dot(y * y, ones, precision=hi,
                 preferred_element_type=jnp.float32)[:, :1]

    # cosine: dot / max(||x||*||y||, eps) == dot * rsqrt(max(sx*sy, eps^2))
    sim = dot * jax.lax.rsqrt(jnp.maximum(sx * sy, _EPS * _EPS))  # (T, 1)

    w = w_ref[...]                                            # (T, 1) in {+1,-1,0}
    # Folded hinge:  +1 -> relu(margin - sim)^2 ; -1 -> relu(sim + margin)^2
    h = jnp.maximum(margin - w * sim, 0.0)
    sq = h * h
    # Zero-weight rows (padding / OOB tail of the partial last tile) are
    # dropped via jnp.where, so garbage / NaN there never contributes.
    acc_pos_ref[...] += jnp.where(w > 0.5, sq, 0.0)
    acc_neg_ref[...] += jnp.where(w < -0.5, sq, 0.0)

    # Deferred vector->scalar reduce + output store: once per core.
    @pl.when(t == pl.num_programs(1) - 1)
    def _finalize():
        out_pos_ref[...] = jnp.broadcast_to(
            jnp.sum(acc_pos_ref[...]), out_pos_ref.shape).astype(jnp.float32)
        out_neg_ref[...] = jnp.broadcast_to(
            jnp.sum(acc_neg_ref[...]), out_neg_ref.shape).astype(jnp.float32)


def supcon_loss_with_cosine(buggy_embd, patch_embd, labels, margin=0.5,
                            tile_rows=None):
    if buggy_embd.shape != patch_embd.shape:
        raise ValueError(
            f"Shape embd1: {buggy_embd.shape} does not match shape embd2: "
            f"{patch_embd.shape}")
    B, S, D = buggy_embd.shape
    if labels.shape[0] != B:
        raise ValueError("Num of labels does not match num of features")

    R = B * S
    itemsize = jnp.dtype(buggy_embd.dtype).itemsize

    if tile_rows is None:
        # ~4 MiB per input pipeline buffer; cap rows to bound lane-sparse
        # per-row temporaries; never allocate more rows than needed.
        target_buf_bytes = 4 * 1024 * 1024
        tile_rows = (target_buf_bytes // max(D * itemsize, 1)) // 8 * 8
        tile_rows = min(tile_rows, 4096)
        tile_rows = min(tile_rows, ((R + 7) // 8) * 8)
        tile_rows = max(tile_rows, 8)
    assert tile_rows % 8 == 0

    num_row_blocks = -(-R // tile_rows)
    num_cores = 2 if num_row_blocks >= 2 else 1          # v7x dual-TC split
    tiles_per_core = -(-num_row_blocks // num_cores)
    total_blocks = num_cores * tiles_per_core
    w_rows = total_blocks * tile_rows

    # Embeddings: reshape only (no pad, no copy).
    x = buggy_embd.reshape(R, D)
    y = patch_embd.reshape(R, D)

    # Signed per-row weight (+1 pos, -1 neg, 0 pad); padding this tiny stream
    # is negligible versus padding the embeddings.
    sign_b = jnp.where(labels == 1, 1.0, -1.0).astype(jnp.float32)   # (B,)
    w = jnp.repeat(sign_b, S)                                        # (R,)
    w = jnp.pad(w, (0, w_rows - R)).reshape(w_rows, 1)

    last_block = num_row_blocks - 1

    def emb_map(c, t):
        # Clamp so a core's overhanging tiles revisit the last real block;
        # those rows carry zero weights and are discarded.
        return (jnp.minimum(c * tiles_per_core + t, last_block), 0)

    def w_map(c, t):
        return (c * tiles_per_core + t, 0)

    out_spec = pl.BlockSpec((8, 128), lambda c, t: (c, 0))
    out_shape = (jax.ShapeDtypeStruct((num_cores * 8, 128), jnp.float32),
                 jax.ShapeDtypeStruct((num_cores * 8, 128), jnp.float32))

    cost = pl.CostEstimate(
        flops=int(R * (6 * D * 128 + 3 * D + 16)),
        transcendentals=int(R),
        bytes_accessed=int(2 * R * D * itemsize + w_rows * 4 + 2 * 8 * 128 * 4))

    out_pos, out_neg = pl.pallas_call(
        functools.partial(_supcon_kernel, margin=float(margin)),
        out_shape=out_shape,
        grid=(num_cores, tiles_per_core),
        in_specs=[
            pl.BlockSpec((tile_rows, D), emb_map),
            pl.BlockSpec((tile_rows, D), emb_map),
            pl.BlockSpec((tile_rows, 1), w_map),
        ],
        out_specs=(out_spec, out_spec),
        scratch_shapes=[pltpu.VMEM((tile_rows, 1), jnp.float32),
                        pltpu.VMEM((tile_rows, 1), jnp.float32)],
        compiler_params=pltpu.CompilerParams(
            dimension_semantics=("parallel", "arbitrary"),
            vmem_limit_bytes=_vmem_limit_bytes()),
        cost_estimate=cost,
    )(x, y, w)

    sum_pos = jnp.sum(out_pos.reshape(num_cores, 8, 128)[:, 0, 0])
    sum_neg = jnp.sum(out_neg.reshape(num_cores, 8, 128)[:, 0, 0])

    n_pos = jnp.sum((labels == 1).astype(jnp.float32))
    n_neg = jnp.asarray(B, jnp.float32) - n_pos
    # NOTE: if one class is empty this divides by zero (inf/nan); PyTorch's
    # mean-of-empty gives NaN, so behavior only approximately matches there.
    loss_positive = sum_pos / (n_pos * S)
    loss_negative = sum_neg / (n_neg * S)
    return loss_positive + loss_negative


def _reference(buggy, patch, labels, margin=0.5):
    # Pure-JAX reference of the PyTorch forward (masked means).
    dot = jnp.sum(buggy * patch, axis=2)
    nx = jnp.linalg.norm(buggy, axis=2)
    ny = jnp.linalg.norm(patch, axis=2)
    sim = dot / jnp.maximum(nx * ny, _EPS)
    is_pos = (labels == 1.0)[:, None]                     # (B, 1)
    S = sim.shape[1]
    pos_sq = jnp.maximum(margin - sim, 0.0) ** 2
    neg_sq = jnp.maximum(sim + margin, 0.0) ** 2
    n_pos = jnp.sum(is_pos) * S
    n_neg = jnp.sum(~is_pos) * S
    lp = jnp.sum(jnp.where(is_pos, pos_sq, 0.0)) / n_pos
    ln = jnp.sum(jnp.where(is_pos, 0.0, neg_sq)) / n_neg
    return lp + ln


if __name__ == "__main__":
    key = jax.random.PRNGKey(0)
    k1, k2, k3, k4, k5, k6 = jax.random.split(key, 6)

    def _check(name, loss, ref):
        if not jnp.allclose(loss, ref, rtol=1e-4, atol=1e-5):
            raise AssertionError(f"mismatch ({name}): pallas={loss} ref={ref}")

    # Case 1: typical small shapes (single tile, single core).
    B, S, D = 4, 8, 32
    buggy = jax.random.normal(k1, (B, S, D), dtype=jnp.float32)
    patch = jax.random.normal(k2, (B, S, D), dtype=jnp.float32)
    labels = jnp.array([1.0, 0.0, 1.0, 0.0], dtype=jnp.float32)
    loss = jax.block_until_ready(
        supcon_loss_with_cosine(buggy, patch, labels, margin=0.5))
    _check("case 1", loss, _reference(buggy, patch, labels, margin=0.5))

    # Case 2: irregular D (not a multiple of 128) and a partial row tile.
    B2, S2, D2 = 3, 5, 40
    b2 = jax.random.normal(k3, (B2, S2, D2), dtype=jnp.float32)
    p2 = jax.random.normal(k4, (B2, S2, D2), dtype=jnp.float32)
    l2 = jnp.array([1.0, 0.0, 1.0], dtype=jnp.float32)
    loss2 = jax.block_until_ready(
        supcon_loss_with_cosine(b2, p2, l2, margin=0.5))
    _check("case 2", loss2, _reference(b2, p2, l2, margin=0.5))

    # Case 3: forced tiny tile -> multi-tile, 2-core split, clamped overhang
    # blocks and a partial last tile, all in one run.
    B3, S3, D3 = 5, 7, 24
    b3 = jax.random.normal(k5, (B3, S3, D3), dtype=jnp.float32)
    p3 = jax.random.normal(k6, (B3, S3, D3), dtype=jnp.float32)
    l3 = jnp.array([1.0, 0.0, 1.0, 1.0, 0.0], dtype=jnp.float32)
    loss3 = jax.block_until_ready(
        supcon_loss_with_cosine(b3, p3, l3, margin=0.5, tile_rows=8))
    _check("case 3", loss3, _reference(b3, p3, l3, margin=0.5))

    print("KERNEL_OK")
</pallas_src>

<mosaic_0001>
module attributes {stable_mosaic.version = 11 : i64} {
  func.func @_supcon_kernel(%arg0: i32, %arg1: i32, %arg2: memref<32x32xf32, #tpu.memory_space<vmem>>, %arg3: memref<32x32xf32, #tpu.memory_space<vmem>>, %arg4: memref<32x1xf32, #tpu.memory_space<vmem>>, %arg5: memref<8x128xf32, #tpu.memory_space<vmem>>, %arg6: memref<8x128xf32, #tpu.memory_space<vmem>>, %arg7: memref<32x1xf32, #tpu.memory_space<vmem>>, %arg8: memref<32x1xf32, #tpu.memory_space<vmem>>) attributes {dimension_semantics = [#tpu.dimension_semantics<parallel>, #tpu.dimension_semantics<arbitrary>], iteration_bounds = array<i64: 1, 1>, scalar_prefetch = 0 : i64, scratch_operands = 2 : i64, tpu.core_type = #tpu.core_type<tc>, window_params = [{transform_indices = @transform_0, window_bounds = array<i64: 32, 32>}, {transform_indices = @transform_1, window_bounds = array<i64: 32, 32>}, {transform_indices = @transform_2, window_bounds = array<i64: 32, 1>}, {transform_indices = @transform_3, window_bounds = array<i64: 8, 128>}, {transform_indices = @transform_4, window_bounds = array<i64: 8, 128>}]} {
    %c0_i32 = arith.constant 0 : i32
    %0 = arith.cmpi eq, %arg1, %c0_i32 : i32
    %1 = arith.extui %0 : i1 to i32
    %c0_i32_0 = arith.constant 0 : i32
    %2 = arith.cmpi ne, %1, %c0_i32_0 : i32
    scf.if %2 {
      %cst_26 = arith.constant 0.000000e+00 : f32
      %44 = vector.broadcast %cst_26 : f32 to vector<32x1xf32>
      %c0_27 = arith.constant 0 : index
      %c0_28 = arith.constant 0 : index
      %45 = vector.load %arg7[%c0_27, %c0_28] : memref<32x1xf32, #tpu.memory_space<vmem>>, vector<32x1xf32>
      tpu.vector_store %arg7[%c0_27, %c0_28], %44 {strides = array<i32>} : memref<32x1xf32, #tpu.memory_space<vmem>>, vector<32x1xf32>,
      %cst_29 = arith.constant 0.000000e+00 : f32
      %46 = vector.broadcast %cst_29 : f32 to vector<32x1xf32>
      %c0_30 = arith.constant 0 : index
      %c0_31 = arith.constant 0 : index
      %47 = vector.load %arg8[%c0_30, %c0_31] : memref<32x1xf32, #tpu.memory_space<vmem>>, vector<32x1xf32>
      tpu.vector_store %arg8[%c0_30, %c0_31], %46 {strides = array<i32>} : memref<32x1xf32, #tpu.memory_space<vmem>>, vector<32x1xf32>,
    } else {
    }
    %c0 = arith.constant 0 : index
    %c0_1 = arith.constant 0 : index
    %3 = vector.load %arg2[%c0, %c0_1] : memref<32x32xf32, #tpu.memory_space<vmem>>, vector<32x32xf32>
    %c0_2 = arith.constant 0 : index
    %c0_3 = arith.constant 0 : index
    %4 = vector.load %arg3[%c0_2, %c0_3] : memref<32x32xf32, #tpu.memory_space<vmem>>, vector<32x32xf32>
    %cst = arith.constant 1.000000e+00 : f32
    %5 = vector.broadcast %cst : f32 to vector<32x128xf32>
    %6 = arith.mulf %3, %4 : vector<32x32xf32>
    %cst_4 = arith.constant dense<0.000000e+00> : vector<32x128xf32>
    %7 = tpu.matmul %6, %5, %cst_4 {dimension_numbers = #tpu.dot_dimension_numbers<[1], [0], [0], [1], [0, 0, 1, 1], [], []>, precision = #tpu.contract_precision<fp32>} : vector<32x32xf32>, vector<32x128xf32>, vector<32x128xf32> -> vector<32x128xf32>
    %8 = vector.extract_strided_slice %7 {offsets = [0, 0], sizes = [32, 1], strides = [1, 1]} : vector<32x128xf32> to vector<32x1xf32>
    %9 = arith.mulf %3, %3 : vector<32x32xf32>
    %cst_5 = arith.constant dense<0.000000e+00> : vector<32x128xf32>
    %10 = tpu.matmul %9, %5, %cst_5 {dimension_numbers = #tpu.dot_dimension_numbers<[1], [0], [0], [1], [0, 0, 1, 1], [], []>, precision = #tpu.contract_precision<fp32>} : vector<32x32xf32>, vector<32x128xf32>, vector<32x128xf32> -> vector<32x128xf32>
    %11 = vector.extract_strided_slice %10 {offsets = [0, 0], sizes = [32, 1], strides = [1, 1]} : vector<32x128xf32> to vector<32x1xf32>
    %12 = arith.mulf %4, %4 : vector<32x32xf32>
    %cst_6 = arith.constant dense<0.000000e+00> : vector<32x128xf32>
    %13 = tpu.matmul %12, %5, %cst_6 {dimension_numbers = #tpu.dot_dimension_numbers<[1], [0], [0], [1], [0, 0, 1, 1], [], []>, precision = #tpu.contract_precision<fp32>} : vector<32x32xf32>, vector<32x128xf32>, vector<32x128xf32> -> vector<32x128xf32>
    %14 = vector.extract_strided_slice %13 {offsets = [0, 0], sizes = [32, 1], strides = [1, 1]} : vector<32x128xf32> to vector<32x1xf32>
    %15 = arith.mulf %11, %14 : vector<32x1xf32>
    %cst_7 = arith.constant 1.000000e-16 : f32
    %16 = vector.broadcast %cst_7 : f32 to vector<32x1xf32>
    %17 = arith.maximumf %15, %16 : vector<32x1xf32>
    %18 = math.rsqrt %17 : vector<32x1xf32>
    %19 = arith.mulf %8, %18 : vector<32x1xf32>
    %c0_8 = arith.constant 0 : index
    %c0_9 = arith.constant 0 : index
    %20 = vector.load %arg4[%c0_8, %c0_9] : memref<32x1xf32, #tpu.memory_space<vmem>>, vector<32x1xf32>
    %21 = arith.mulf %20, %19 : vector<32x1xf32>
    %cst_10 = arith.constant 5.000000e-01 : f32
    %22 = vector.broadcast %cst_10 : f32 to vector<32x1xf32>
    %23 = arith.subf %22, %21 : vector<32x1xf32>
    %cst_11 = arith.constant 0.000000e+00 : f32
    %24 = vector.broadcast %cst_11 : f32 to vector<32x1xf32>
    %25 = arith.maximumf %23, %24 : vector<32x1xf32>
    %26 = arith.mulf %25, %25 : vector<32x1xf32>
    %c0_12 = arith.constant 0 : index
    %c0_13 = arith.constant 0 : index
    %27 = vector.load %arg7[%c0_12, %c0_13] : memref<32x1xf32, #tpu.memory_space<vmem>>, vector<32x1xf32>
    %cst_14 = arith.constant 5.000000e-01 : f32
    %28 = vector.broadcast %cst_14 : f32 to vector<32x1xf32>
    %29 = arith.cmpf ogt, %20, %28 : vector<32x1xf32>
    %cst_15 = arith.constant 0.000000e+00 : f32
    %30 = vector.broadcast %cst_15 : f32 to vector<32x1xf32>
    %31 = arith.select %29, %26, %30 : vector<32x1xi1>, vector<32x1xf32>
    %32 = arith.addf %27, %31 : vector<32x1xf32>
    %c0_16 = arith.constant 0 : index
    %c0_17 = arith.constant 0 : index
    %33 = vector.load %arg7[%c0_16, %c0_17] : memref<32x1xf32, #tpu.memory_space<vmem>>, vector<32x1xf32>
    tpu.vector_store %arg7[%c0_16, %c0_17], %32 {strides = array<i32>} : memref<32x1xf32, #tpu.memory_space<vmem>>, vector<32x1xf32>,
    %c0_18 = arith.constant 0 : index
    %c0_19 = arith.constant 0 : index
    %34 = vector.load %arg8[%c0_18, %c0_19] : memref<32x1xf32, #tpu.memory_space<vmem>>, vector<32x1xf32>
    %cst_20 = arith.constant -5.000000e-01 : f32
    %35 = vector.broadcast %cst_20 : f32 to vector<32x1xf32>
    %36 = arith.cmpf olt, %20, %35 : vector<32x1xf32>
    %cst_21 = arith.constant 0.000000e+00 : f32
    %37 = vector.broadcast %cst_21 : f32 to vector<32x1xf32>
    %38 = arith.select %36, %26, %37 : vector<32x1xi1>, vector<32x1xf32>
    %39 = arith.addf %34, %38 : vector<32x1xf32>
    %c0_22 = arith.constant 0 : index
    %c0_23 = arith.constant 0 : index
    %40 = vector.load %arg8[%c0_22, %c0_23] : memref<32x1xf32, #tpu.memory_space<vmem>>, vector<32x1xf32>
    tpu.vector_store %arg8[%c0_22, %c0_23], %39 {strides = array<i32>} : memref<32x1xf32, #tpu.memory_space<vmem>>, vector<32x1xf32>,
    %c0_i32_24 = arith.constant 0 : i32
    %41 = arith.cmpi eq, %arg1, %c0_i32_24 : i32
    %42 = arith.extui %41 : i1 to i32
    %c0_i32_25 = arith.constant 0 : i32
    %43 = arith.cmpi ne, %42, %c0_i32_25 : i32
    scf.if %43 {
      %c0_26 = arith.constant 0 : index
      %c0_27 = arith.constant 0 : index
      %44 = vector.load %arg7[%c0_26, %c0_27] : memref<32x1xf32, #tpu.memory_space<vmem>>, vector<32x1xf32>
      %45 = vector.shape_cast %44 : vector<32x1xf32> to vector<1x32x1xf32>
      %cst_28 = arith.constant dense<0.000000e+00> : vector<1xf32>
      %46 = vector.multi_reduction <add>, %45, %cst_28 [1, 2] : vector<1x32x1xf32> to vector<1xf32>
      %47 = vector.shape_cast %46 : vector<1xf32> to vector<1x1x1xf32>
      %48 = vector.extract %47[0, 0, 0] : f32 from vector<1x1x1xf32>
      %49 = vector.broadcast %48 : f32 to vector<8x128xf32>
      %c0_29 = arith.constant 0 : index
      %c0_30 = arith.constant 0 : index
      %50 = vector.load %arg5[%c0_29, %c0_30] : memref<8x128xf32, #tpu.memory_space<vmem>>, vector<8x128xf32>
      tpu.vector_store %arg5[%c0_29, %c0_30], %49 {strides = array<i32>} : memref<8x128xf32, #tpu.memory_space<vmem>>, vector<8x128xf32>,
      %c0_31 = arith.constant 0 : index
      %c0_32 = arith.constant 0 : index
      %51 = vector.load %arg8[%c0_31, %c0_32] : memref<32x1xf32, #tpu.memory_space<vmem>>, vector<32x1xf32>
      %52 = vector.shape_cast %51 : vector<32x1xf32> to vector<1x32x1xf32>
      %cst_33 = arith.constant dense<0.000000e+00> : vector<1xf32>
      %53 = vector.multi_reduction <add>, %52, %cst_33 [1, 2] : vector<1x32x1xf32> to vector<1xf32>
      %54 = vector.shape_cast %53 : vector<1xf32> to vector<1x1x1xf32>
      %55 = vector.extract %54[0, 0, 0] : f32 from vector<1x1x1xf32>
      %56 = vector.broadcast %55 : f32 to vector<8x128xf32>
      %c0_34 = arith.constant 0 : index
      %c0_35 = arith.constant 0 : index
      %57 = vector.load %arg6[%c0_34, %c0_35] : memref<8x128xf32, #tpu.memory_space<vmem>>, vector<8x128xf32>
      tpu.vector_store %arg6[%c0_34, %c0_35], %56 {strides = array<i32>} : memref<8x128xf32, #tpu.memory_space<vmem>>, vector<8x128xf32>,
    } else {
    }
    return
  }
  func.func @transform_0(%arg0: i32, %arg1: i32) -> (i32, i32) {
    %c1_i32 = arith.constant 1 : i32
    %0 = arith.muli %arg0, %c1_i32 : i32
    %1 = arith.addi %0, %arg1 : i32
    %c0_i32 = arith.constant 0 : i32
    %2 = arith.minsi %1, %c0_i32 : i32
    %c0_i32_0 = arith.constant 0 : i32
    %c0_i32_1 = arith.constant 0 : i32
    return %2, %c0_i32_0 : i32, i32
  }
  func.func @transform_1(%arg0: i32, %arg1: i32) -> (i32, i32) {
    %c1_i32 = arith.constant 1 : i32
    %0 = arith.muli %arg0, %c1_i32 : i32
    %1 = arith.addi %0, %arg1 : i32
    %c0_i32 = arith.constant 0 : i32
    %2 = arith.minsi %1, %c0_i32 : i32
    %c0_i32_0 = arith.constant 0 : i32
    %c0_i32_1 = arith.constant 0 : i32
    return %2, %c0_i32_0 : i32, i32
  }
  func.func @transform_2(%arg0: i32, %arg1: i32) -> (i32, i32) {
    %c1_i32 = arith.constant 1 : i32
    %0 = arith.muli %arg0, %c1_i32 : i32
    %1 = arith.addi %0, %arg1 : i32
    %c0_i32 = arith.constant 0 : i32
    %c0_i32_0 = arith.constant 0 : i32
    return %1, %c0_i32 : i32, i32
  }
  func.func @transform_3(%arg0: i32, %arg1: i32) -> (i32, i32) {
    %c0_i32 = arith.constant 0 : i32
    %c0_i32_0 = arith.constant 0 : i32
    return %arg0, %c0_i32 : i32, i32
  }
  func.func @transform_4(%arg0: i32, %arg1: i32) -> (i32, i32) {
    %c0_i32 = arith.constant 0 : i32
    %c0_i32_0 = arith.constant 0 : i32
    return %arg0, %c0_i32 : i32, i32
  }
}

</mosaic_0001>

<bundles_post_ra>
// kernel: tpu_custom_call.1
= control target key start
LH: loop header
LB: loop body
LE: loop exit
PB: predicated region body
PF: predicated region fallthrough
CT: control target
= control target key end

     0   :  { %10 = vsyncpa [#allocation5], 0  ;;  %s2818_s0 = inlined_call_operand.vmem [shape: f32[32,32], index: 0, kind: input, shape index: {}]   ;;  %s2819_s1 = inlined_call_operand.hbm [shape: f32[32,32], index: 1, kind: input, shape index: {}]   ;;  %s2820_s2 = inlined_call_operand.vmem [shape: f32[32,1], index: 2, kind: input, shape index: {}]   ;;  %s2821_s3 = inlined_call_operand.hbm [shape: f32[8,128], index: 3, kind: output, shape index: {0}]   ;;  %s2822_s4 = inlined_call_operand.hbm [shape: f32[8,128], index: 4, kind: output, shape index: {1}]  }
   0x1   :  { %11 = vsyncpa [#allocation6], 0 }
   0x2   :  { %12 = vsyncpa [#allocation9], 0  ;;  %s2427_s15 = smov [#allocation4]  }
   0x3   :  { %s38_s16 = sshll.u32 %s2427_s15, 4  ;;  %s39_s16 = int_to_ptr.vmem [resolvable:$true] %s38_s16 }
   0x4   :  { %s2369_s17 = scalar_lea.vmem %s39_s16, 512  ;;  %p2374_p1 = scmp.lt.s32.totalorder %s39_s16, %s39_s16 }
   0x5   :  { %p2370_p0 = scmp.ne.s32.totalorder %s39_s16, %s2369_s17  ;;  %p2375_p2 = scmp.lt.s32.totalorder %s2369_s17, %s2369_s17 }
   0x7   :  { %p2376_p3 = por %p2375_p2, %p2374_p1 }
   0x9   :  { %p2377_p4 = pnand %p2376_p3, %p2370_p0 }
   0xb   :  { %2380 = shalt.err (!%p2377_p4)
}
   0xc   :  { %s2428_s18 = smov 128   ;;  %s2429_s19 = smov 8  }
   0xd   :  { %44 = dma.hbm_to_vmem [thread:$0]  %s2819_s1, 512, %s39_s16, [#allocation5], %s2428_s18, %s2428_s18, %s2429_s19  }
   0xe   :  { %2421 = dma.done.wait [#allocation5], 512  }
   0xf   :  { %2422 = vsyncadd [#allocation5], 4294966784  ;;  %v2430_v0 = vmov 0.0   ;;  %v2431_v1 = vmov 1.0   ;;  %v109_v2 = vld [vmem:[%s2818_s0] sm:$0xff]  ;;  %vm121_vm0 = vcmask 261120  }
  0x10   :  { %2150 = vmatprep.subr.mxu1 %v2430_v0  ;;  %2136 = vmatprep.subr.mxu0 %v2431_v1  ;;  %v2474_v3 = vld [vmem:[#allocation4] sm:$0xff]  ;;  %v110_v4 = vld [vmem:[%s2818_s0 + $0x8] sm:$0xff]  ;;  %v111_v7 = vld [vmem:[%s2818_s0 + $0x10] sm:$0xff]  ;;  %v696_v24 = vmul.f32 %v109_v2, %v109_v2  ;;  %vm100_vm1 = vcmask 7168   ;;  %s2433_s12 = smov [#allocation8]  }
  0x11   :  { %2151 = vmatpush3.msra.mxu1 %v2430_v0  ;;  %2137 = vmatpush3.msra.mxu0 %v2431_v1  ;;  %v117_v5 = vmul.f32 %v2474_v3, %v109_v2  ;;  %v2481_v6 = vld [vmem:[#allocation4 + $0x8] sm:$0xff]  ;;  %v2486_v8 = vld [vmem:[#allocation4 + $0x10] sm:$0xff]  ;;  %v112_v11 = vld [vmem:[%s2818_s0 + $0x18] sm:$0xff]  ;;  %v697_v28 = vmul.f32 %v110_v4, %v110_v4  ;;  %v698_v35 = vmul.f32 %v111_v7, %v111_v7  ;;  %s1992_s13 = sshll.u32 %s2433_s12, 4  ;;  %s1993_s13 = int_to_ptr.vmem [resolvable:$true] %s1992_s13 }
  0x12   :  { %2138 = vmatprep.subr.mxu0 %v2431_v1  ;;  %2158 = vmatprep.subr.mxu1 %v2430_v0  ;;  %v118_v9 = vmul.f32 %v2481_v6, %v110_v4  ;;  %v119_v10 = vmul.f32 %v2486_v8, %v111_v7  ;;  %v2494_v12 = vld [vmem:[#allocation4 + $0x18] sm:$0xff]  ;;  %v701_v34 = vsel %vm121_vm0, %v696_v24, 0  ;;  %v699_v41 = vmul.f32 %v112_v11, %v112_v11 }
  0x13   :  { %2139 = vmatpush3.msra.mxu0 %v2431_v1  ;;  %v123_v13 = vsel %vm121_vm0, %v117_v5, 0  ;;  %v120_v14 = vmul.f32 %v2494_v12, %v112_v11  ;;  %v704_v39 = vsel %vm121_vm0, %v697_v28, 0  ;;  %v2526_v43 = vand.u32 4294901760, %v701_v34  ;;  %102 = vst.msk [vmem:[#allocation2 + $0x8] sm:$0xff] %vm100_vm1, %v2430_v0  ;;  %106 = vst.msk [vmem:[#allocation3 + $0x8] sm:$0xff] %vm100_vm1, %v2430_v0 }
  0x14   :  { %2140 = vmatprep.subr.mxu0 %v2431_v1  ;;  %v2499_v15 = vand.u32 4294901760, %v123_v13  ;;  %v126_v16 = vsel %vm121_vm0, %v118_v9, 0  ;;  %v129_v18 = vsel %vm121_vm0, %v119_v10, 0  ;;  %v707_v45 = vsel %vm121_vm0, %v698_v35, 0  ;;  %101 = vst.msk [vmem:[#allocation2] sm:$0xff] %vm100_vm1, %v2430_v0  ;;  %103 = vst.msk [vmem:[#allocation2 + $0x10] sm:$0xff] %vm100_vm1, %v2430_v0 }
  0x15   :  { %2141 = vmatpush3.msra.mxu0 %v2431_v1  ;;  %v2502_v17 = vand.u32 4294901760, %v126_v16  ;;  %v132_v19 = vsel %vm121_vm0, %v120_v14, 0  ;;  %v2507_v20 = vand.u32 4294901760, %v129_v18  ;;  %v2529_v46 = vand.u32 4294901760, %v704_v39  ;;  %104 = vst.msk [vmem:[#allocation2 + $0x18] sm:$0xff] %vm100_vm1, %v2430_v0  ;;  %105 = vst.msk [vmem:[#allocation3] sm:$0xff] %vm100_vm1, %v2430_v0 }
  0x16   :  { %2142 = vmatprep.subr.mxu0 %v2431_v1  ;;  %2152 = vmatprep.mubr.f32.mxu1 %v2499_v15  ;;  %v2509_v21 = vand.u32 4294901760, %v132_v19  ;;  %v200_v22 = vsub.f32 %v123_v13, %v2499_v15  ;;  %v710_v47 = vsel %vm121_vm0, %v699_v41, 0  ;;  %v2537_v48 = vsub.f32 %v701_v34, %v2526_v43  ;;  %107 = vst.msk [vmem:[#allocation3 + $0x10] sm:$0xff] %vm100_vm1, %v2430_v0 }
  0x17   :  { %2143 = vmatpush3.msra.mxu0 %v2431_v1  ;;  %2153 = vmatmul.mubr.f32.vlgmr.msra.gmra.mxu1 %v2502_v17  ;;  %v210_v23 = vsub.f32 %v126_v16, %v2502_v17  ;;  %v220_v26 = vsub.f32 %v129_v18, %v2507_v20  ;;  %v2539_v49 = vand.u32 4294901760, %v707_v45  ;;  %v2543_v50 = vsub.f32 %v704_v39, %v2529_v46 }
  0x18   :  { %2166 = vmatprep.subr.mxu0 %v2431_v1  ;;  %2159 = vmatpush3.msra.mxu1 %v2430_v0  ;;  %v201_v25 = vand.u32 4294901760, %v200_v22  ;;  %v2518_v27 = vsub.f32 %v132_v19, %v2509_v21  ;;  %v2547_v51 = vand.u32 4294901760, %v710_v47  ;;  %v779_v52 = vand.u32 4294901760, %v2537_v48  ;;  %108 = vst.msk [vmem:[#allocation3 + $0x18] sm:$0xff] %vm100_vm1, %v2430_v0 }
  0x19   :  { %2155 = vmatprep.mubr.f32.mxu1 %v2507_v20  ;;  %v211_v29 = vand.u32 4294901760, %v210_v23  ;;  %2180 = vmatprep.subr.mxu1 %v2430_v0  ;;  %v221_v31 = vand.u32 4294901760, %v220_v26  ;;  %v2554_v53 = vsub.f32 %v707_v45, %v2539_v49  ;;  %v789_v54 = vand.u32 4294901760, %v2543_v50 }
  0x1a   :  { %v202_v30 = vsub.f32 %v200_v22, %v201_v25  ;;  %v231_v32 = vand.u32 4294901760, %v2518_v27  ;;  %v2561_v55 = vsub.f32 %v710_v47, %v2547_v51  ;;  %v780_v56 = vsub.f32 %v2537_v48, %v779_v52 }
  0x1b   :  { %2156 = vmatmul.mubr.f32.gmra.mxu1 %v2509_v21  ;;  %v212_v33 = vsub.f32 %v210_v23, %v211_v29  ;;  %v222_v37 = vsub.f32 %v220_v26, %v221_v31  ;;  %v799_v57 = vand.u32 4294901760, %v2554_v53  ;;  %v790_v58 = vsub.f32 %v2543_v50, %v789_v54 }
  0x1c   :  { %v203_v36 = vand.u32 4294901760, %v202_v30  ;;  %2160 = vmatprep.mubr.f32.mxu1 %v200_v22  ;;  %v232_v38 = vsub.f32 %v2518_v27, %v231_v32  ;;  %v809_v59 = vand.u32 4294901760, %v2561_v55  ;;  %v781_v60 = vand.u32 4294901760, %v780_v56 }
  0x1d   :  { %v213_v40 = vand.u32 4294901760, %v212_v33  ;;  %v223_v42 = vand.u32 4294901760, %v222_v37  ;;  %v800_v61 = vsub.f32 %v2554_v53, %v799_v57  ;;  %v791_v62 = vand.u32 4294901760, %v790_v58 }
  0x1e   :  { %2144 = vmatprep.mubr.f32.mxu0 %v203_v36  ;;  %v233_v44 = vand.u32 4294901760, %v232_v38  ;;  %v810_v63 = vsub.f32 %v2561_v55, %v809_v59  ;;  %v1274_v5 = vmul.f32 %v2474_v3, %v2474_v3  ;;  %v1275_v7 = vmul.f32 %v2481_v6, %v2481_v6 }
  0x1f   :  { %2145 = vmatmul.mubr.f32.vlgmr.msra.gmra.mxu0 %v213_v40  ;;  %2161 = vmatmul.mubr.f32.vlgmr.msra.gmra.mxu1 %v210_v23  ;;  %v801_v2 = vand.u32 4294901760, %v800_v61  ;;  %v1276_v3 = vmul.f32 %v2486_v8, %v2486_v8  ;;  %v1277_v10 = vmul.f32 %v2494_v12, %v2494_v12 }
  0x20   :  { %2167 = vmatpush3.msra.mxu0 %v2431_v1  ;;  %2181 = vmatpush3.msra.mxu1 %v2430_v0  ;;  %v811_v4 = vand.u32 4294901760, %v810_v63  ;;  %v1279_v9 = vsel %vm121_vm0, %v1274_v5, 0  ;;  %v1282_v6 = vsel %vm121_vm0, %v1275_v7, 0 }
  0x21   :  { %2168 = vmatprep.subr.mxu0 %v2431_v1  ;;  %2147 = vmatprep.mubr.f32.mxu0 %v223_v42  ;;  %v2616_v11 = vand.u32 4294901760, %v1279_v9  ;;  %v2618_v13 = vand.u32 4294901760, %v1282_v6  ;;  %v1285_v8 = vsel %vm121_vm0, %v1276_v3, 0  ;;  %v1288_v14 = vsel %vm121_vm0, %v1277_v10, 0 }
  0x22   :  { %2169 = vmatpush3.msra.mxu0 %v2431_v1  ;;  %2163 = vmatprep.mubr.f32.mxu1 %v220_v26 }
  0x23   :  { %2170 = vmatprep.subr.mxu0 %v2431_v1  ;;  %2148 = vmatmul.mubr.f32.gmra.mxu0 %v233_v44  ;;  %v2631_v12 = vsub.f32 %v1279_v9, %v2616_v11  ;;  %v2636_v16 = vsub.f32 %v1282_v6, %v2618_v13 }
  0x24   :  { %2164 = vmatmul.mubr.f32.gmra.mxu1 %v2518_v27  ;;  %2171 = vmatpush3.msra.mxu0 %v2431_v1 }
  0x25   :  { %2172 = vmatprep.subr.mxu0 %v2431_v1  ;;  %2174 = vmatprep.mubr.f32.mxu0 %v201_v25  ;;  %v1357_v18 = vand.u32 4294901760, %v2631_v12 }
  0x26   :  { %2173 = vmatpush3.msra.mxu0 %v2431_v1  ;;  %2182 = vmatprep.mubr.f32.mxu1 %v2499_v15 }
  0x27   :  { %2188 = vmatprep.subr.mxu0 %v2431_v1  ;;  %2175 = vmatmul.mubr.f32.vlgmr.msra.gmra.mxu0 %v211_v29  ;;  %v1358_v22 = vsub.f32 %v2631_v12, %v1357_v18 }
  0x28   :  { %2183 = vmatmul.mubr.f32.vlgmr.msra.gmra.mxu1 %v2502_v17  ;;  %2189 = vmatpush3.msra.mxu0 %v2431_v1 }
  0x29   :  { %2202 = vmatprep.subr.mxu1 %v2431_v1  ;;  %2190 = vmatprep.subr.mxu0 %v2431_v1  ;;  %v1359_v26 = vand.u32 4294901760, %v1358_v22 }
  0x2a   :  { %2203 = vmatpush3.msra.mxu1 %v2431_v1  ;;  %2191 = vmatpush3.msra.mxu0 %v2431_v1 }
  0x2b   :  { %2204 = vmatprep.subr.mxu1 %v2431_v1  ;;  %2177 = vmatprep.mubr.f32.mxu0 %v221_v31 }
  0x2c   :  { %2185 = vmatprep.mubr.f32.mxu1 %v2507_v20  ;;  %2192 = vmatprep.subr.mxu0 %v2431_v1 }
  0x2d   :  { %2205 = vmatpush3.msra.mxu1 %v2431_v1  ;;  %2178 = vmatmul.mubr.f32.gmra.mxu0 %v231_v32 }
  0x2e   :  { %2186 = vmatmul.mubr.f32.gmra.mxu1 %v2509_v21  ;;  %2193 = vmatpush3.msra.mxu0 %v2431_v1 }
  0x2f   :  { %2206 = vmatprep.subr.mxu1 %v2431_v1  ;;  %2194 = vmatprep.subr.mxu0 %v2431_v1 }
  0x30   :  { %2207 = vmatpush3.msra.mxu1 %v2431_v1  ;;  %2195 = vmatpush3.msra.mxu0 %v2431_v1 }
  0x31   :  { %2208 = vmatprep.subr.mxu1 %v2431_v1  ;;  %2196 = vmatprep.mubr.f32.mxu0 %v2499_v15  ;;  %v2633_v15 = vand.u32 4294901760, %v1285_v8 }
  0x32   :  { %2209 = vmatpush3.msra.mxu1 %v2431_v1  ;;  %2210 = vmatprep.mubr.f32.mxu1 %v781_v60 }
  0x33   :  { %2216 = vmatprep.subr.mxu0 %v2430_v0  ;;  %2197 = vmatmul.mubr.f32.vlgmr.msra.gmra.mxu0 %v2502_v17  ;;  %v2640_v17 = vand.u32 4294901760, %v1288_v14  ;;  %v2651_v19 = vsub.f32 %v1285_v8, %v2633_v15 }
  0x34   :  { %2211 = vmatmul.mubr.f32.vlgmr.msra.gmra.mxu1 %v791_v62  ;;  %2217 = vmatpush3.msra.mxu0 %v2430_v0 }
  0x35   :  { %2224 = vmatprep.subr.mxu1 %v2430_v0  ;;  %2199 = vmatprep.mubr.f32.mxu0 %v2507_v20  ;;  %v1367_v20 = vand.u32 4294901760, %v2636_v16  ;;  %v1377_v23 = vand.u32 4294901760, %v2651_v19 }
  0x36   :  { %2225 = vmatpush3.msra.mxu1 %v2430_v0  ;;  %2213 = vmatprep.mubr.f32.mxu1 %v801_v2 }
  0x37   :  { %2200 = vmatmul.mubr.f32.gmra.mxu0 %v2509_v21  ;;  %2232 = vmatprep.subr.mxu0 %v2431_v1  ;;  %v2658_v21 = vsub.f32 %v1288_v14, %v2640_v17  ;;  %v1368_v24 = vsub.f32 %v2636_v16, %v1367_v20  ;;  %v1378_v27 = vsub.f32 %v2651_v19, %v1377_v23 }
  0x38   :  { %2214 = vmatmul.mubr.f32.gmra.mxu1 %v811_v4  ;;  %2218 = vmatprep.mubr.f32.mxu0 %v2526_v43 }
  0x39   :  { %2226 = vmatprep.mubr.f32.mxu1 %v2537_v48  ;;  %2246 = vmatprep.subr.mxu1 %v2430_v0  ;;  %v1387_v25 = vand.u32 4294901760, %v2658_v21  ;;  %v1369_v28 = vand.u32 4294901760, %v1368_v24  ;;  %v1379_v30 = vand.u32 4294901760, %v1378_v27 }
  0x3b   :  { %2219 = vmatmul.mubr.f32.vlgmr.msra.gmra.mxu0 %v2529_v46  ;;  %v1388_v29 = vsub.f32 %v2658_v21, %v1387_v25 }
  0x3c   :  { %2227 = vmatmul.mubr.f32.vlgmr.msra.gmra.mxu1 %v2543_v50  ;;  %2233 = vmatpush3.msra.mxu0 %v2431_v1 }
  0x3d   :  { %2234 = vmatprep.subr.mxu0 %v2431_v1  ;;  %2247 = vmatpush3.msra.mxu1 %v2430_v0  ;;  %v1389_v31 = vand.u32 4294901760, %v1388_v29 }
  0x3e   :  { %2235 = vmatpush3.msra.mxu0 %v2431_v1  ;;  %2221 = vmatprep.mubr.f32.mxu0 %v2539_v49 }
  0x3f   :  { %2229 = vmatprep.mubr.f32.mxu1 %v2554_v53  ;;  %2236 = vmatprep.subr.mxu0 %v2431_v1 }
  0x40   :  { %2222 = vmatmul.mubr.f32.gmra.mxu0 %v2547_v51  ;;  %2230 = vmatmul.mubr.f32.gmra.mxu1 %v2561_v55 }
  0x41   :  { %2237 = vmatpush3.msra.mxu0 %v2431_v1  ;;  %2240 = vmatprep.mubr.f32.mxu0 %v779_v52 }
  0x42   :  { %2238 = vmatprep.subr.mxu0 %v2431_v1  ;;  %2248 = vmatprep.mubr.f32.mxu1 %v2526_v43 }
  0x43   :  { %2239 = vmatpush3.msra.mxu0 %v2431_v1  ;;  %2268 = vmatprep.subr.mxu1 %v2431_v1 }
  0x44   :  { %2254 = vmatprep.subr.mxu0 %v2431_v1  ;;  %2241 = vmatmul.mubr.f32.vlgmr.msra.gmra.mxu0 %v789_v54 }
  0x45   :  { %2249 = vmatmul.mubr.f32.vlgmr.msra.gmra.mxu1 %v2529_v46  ;;  %2255 = vmatpush3.msra.mxu0 %v2431_v1 }
  0x46   :  { %2256 = vmatprep.subr.mxu0 %v2431_v1  ;;  %2269 = vmatpush3.msra.mxu1 %v2431_v1 }
  0x47   :  { %2257 = vmatpush3.msra.mxu0 %v2431_v1  ;;  %2270 = vmatprep.subr.mxu1 %v2431_v1 }
  0x48   :  { %2243 = vmatprep.mubr.f32.mxu0 %v799_v57  ;;  %2251 = vmatprep.mubr.f32.mxu1 %v2539_v49 }
  0x49   :  { %2258 = vmatprep.subr.mxu0 %v2431_v1  ;;  %2271 = vmatpush3.msra.mxu1 %v2431_v1 }
  0x4a   :  { %2244 = vmatmul.mubr.f32.gmra.mxu0 %v809_v59  ;;  %2252 = vmatmul.mubr.f32.gmra.mxu1 %v2547_v51 }
  0x4b   :  { %2259 = vmatpush3.msra.mxu0 %v2431_v1  ;;  %2272 = vmatprep.subr.mxu1 %v2431_v1 }
  0x4c   :  { %2260 = vmatprep.subr.mxu0 %v2431_v1  ;;  %2273 = vmatpush3.msra.mxu1 %v2431_v1 }
  0x4d   :  { %2261 = vmatpush3.msra.mxu0 %v2431_v1  ;;  %2274 = vmatprep.subr.mxu1 %v2431_v1 }
  0x4e   :  { %2262 = vmatprep.mubr.f32.mxu0 %v2526_v43  ;;  %2275 = vmatpush3.msra.mxu1 %v2431_v1 }
  0x4f   :  { %2276 = vmatprep.mubr.f32.mxu1 %v1359_v26  ;;  %2282 = vmatprep.subr.mxu0 %v2430_v0 }
  0x50   :  { %2263 = vmatmul.mubr.f32.vlgmr.msra.gmra.mxu0 %v2529_v46  ;;  %2277 = vmatmul.mubr.f32.vlgmr.msra.gmra.mxu1 %v1369_v28 }
  0x51   :  { %2283 = vmatpush3.msra.mxu0 %v2430_v0  ;;  %2290 = vmatprep.subr.mxu1 %v2430_v0 }
  0x52   :  { %2291 = vmatpush3.msra.mxu1 %v2430_v0  ;;  %2265 = vmatprep.mubr.f32.mxu0 %v2539_v49 }
  0x53   :  { %2279 = vmatprep.mubr.f32.mxu1 %v1379_v30  ;;  %2298 = vmatprep.subr.mxu0 %v2431_v1 }
  0x54   :  { %2266 = vmatmul.mubr.f32.gmra.mxu0 %v2547_v51  ;;  %2280 = vmatmul.mubr.f32.gmra.mxu1 %v1389_v31 }
  0x55   :  { %2284 = vmatprep.mubr.f32.mxu0 %v2616_v11  ;;  %2292 = vmatprep.mubr.f32.mxu1 %v2631_v12 }
  0x56   :  { %2312 = vmatprep.subr.mxu1 %v2430_v0 }
  0x58   :  { %2285 = vmatmul.mubr.f32.vlgmr.msra.gmra.mxu0 %v2618_v13  ;;  %2293 = vmatmul.mubr.f32.vlgmr.msra.gmra.mxu1 %v2636_v16 }
  0x59   :  { %2299 = vmatpush3.msra.mxu0 %v2431_v1  ;;  %2313 = vmatpush3.msra.mxu1 %v2430_v0 }
  0x5a   :  { %2300 = vmatprep.subr.mxu0 %v2431_v1  ;;  %2287 = vmatprep.mubr.f32.mxu0 %v2633_v15 }
  0x5b   :  { %2301 = vmatpush3.msra.mxu0 %v2431_v1  ;;  %2295 = vmatprep.mubr.f32.mxu1 %v2651_v19 }
  0x5c   :  { %2302 = vmatprep.subr.mxu0 %v2431_v1  ;;  %2288 = vmatmul.mubr.f32.gmra.mxu0 %v2640_v17 }
  0x5d   :  { %2296 = vmatmul.mubr.f32.gmra.mxu1 %v2658_v21  ;;  %2303 = vmatpush3.msra.mxu0 %v2431_v1 }
  0x5e   :  { %2304 = vmatprep.subr.mxu0 %v2431_v1  ;;  %2306 = vmatprep.mubr.f32.mxu0 %v1357_v18 }
  0x5f   :  { %2305 = vmatpush3.msra.mxu0 %v2431_v1  ;;  %2314 = vmatprep.mubr.f32.mxu1 %v2616_v11 }
  0x60   :  { %2320 = vmatprep.subr.mxu0 %v2431_v1  ;;  %2307 = vmatmul.mubr.f32.vlgmr.msra.gmra.mxu0 %v1367_v20 }
  0x61   :  { %2315 = vmatmul.mubr.f32.vlgmr.msra.gmra.mxu1 %v2618_v13  ;;  %2334 = vmatprep.subr.mxu1 %v2431_v1 }
  0x62   :  { %2321 = vmatpush3.msra.mxu0 %v2431_v1  ;;  %2338 = vmatpush3.msra.mxu1 %v2431_v1 }
  0x63   :  { %2322 = vmatprep.subr.mxu0 %v2431_v1  ;;  %2335 = vmatprep.subr.mxu1 %v2431_v1 }
  0x64   :  { %2323 = vmatpush3.msra.mxu0 %v2431_v1  ;;  %2309 = vmatprep.mubr.f32.mxu0 %v1377_v23 }
  0x65   :  { %2317 = vmatprep.mubr.f32.mxu1 %v2633_v15  ;;  %2339 = vmatpush3.msra.mxu1 %v2431_v1 }
  0x66   :  { %2324 = vmatprep.subr.mxu0 %v2431_v1  ;;  %2310 = vmatmul.mubr.f32.gmra.mxu0 %v1387_v25 }
  0x67   :  { %2318 = vmatmul.mubr.f32.gmra.mxu1 %v2640_v17  ;;  %2336 = vmatprep.subr.mxu1 %v2431_v1 }
  0x68   :  { %2325 = vmatpush3.msra.mxu0 %v2431_v1  ;;  %2340 = vmatpush3.msra.mxu1 %v2431_v1 }
  0x69   :  { %2326 = vmatprep.subr.mxu0 %v2431_v1  ;;  %2337 = vmatprep.subr.mxu1 %v2431_v1 }
  0x6a   :  { %2327 = vmatpush3.msra.mxu0 %v2431_v1  ;;  %2341 = vmatpush3.msra.mxu1 %v2431_v1 }
  0x6b   :  { %2328 = vmatprep.mubr.f32.mxu0 %v2616_v11  ;;  %2331 = vmatprep.mubr.f32.mxu1 %v2633_v15 }
  0x6c   :  { %2329 = vmatmul.mubr.f32.vlgmr.msra.gmra.mxu0 %v2618_v13  ;;  %2332 = vmatmul.mubr.f32.vlgmr.msra.gmra.mxu1 %v2640_v17 }
  0xd7   :  { %v2154_v1 = vpop.f32.mrf.mxu1 }
  0xd9   :  { %v306_v32 = vpop.f32.mrf.mxu1 }
  0xdb   :  { %v2157_v33 = vpop.f32.mrf.mxu1 }
  0xdd   :  { %v318_v34 = vpop.f32.mrf.mxu1 }
  0xdf   :  { %v2146_v35 = vpop.f32.mrf.mxu0  ;;  %v2162_v36 = vpop.f32.mrf.mxu1 }
  0xe0   :  { %v313_v37 = vadd.f32 %v2154_v1, %v2146_v35 }
  0xe1   :  { %v205_v38 = vpop.f32.mrf.mxu0  ;;  %v396_v39 = vpop.f32.mrf.mxu1 }
  0xe2   :  { %v404_v40 = vadd.f32 %v2162_v36, %v313_v37  ;;  %v307_v41 = vadd.f32 %v306_v32, %v205_v38 }
  0xe3   :  { %v2149_v42 = vpop.f32.mrf.mxu0 }
  0xe4   :  { %v397_v43 = vadd.f32 %v396_v39, %v307_v41  ;;  %v325_v44 = vadd.f32 %v2157_v33, %v2149_v42  ;;  %v2165_v45 = vpop.f32.mrf.mxu1 }
  0xe5   :  { %v225_v46 = vpop.f32.mrf.mxu0 }
  0xe6   :  { %v418_v47 = vadd.f32 %v2165_v45, %v325_v44  ;;  %v319_v48 = vadd.f32 %v318_v34, %v225_v46  ;;  %v410_v49 = vpop.f32.mrf.mxu1 }
  0xe7   :  { %v2176_v0 = vpop.f32.mrf.mxu0 }
  0xe8   :  { %v411_v50 = vadd.f32 %v410_v49, %v319_v48  ;;  %v499_v51 = vadd.f32 %v2176_v0, %v404_v40  ;;  %v2184_v52 = vpop.f32.mrf.mxu1 }
  0xe9   :  { %v490_v53 = vpop.f32.mrf.mxu0 }
  0xea   :  { %v592_v54 = vadd.f32 %v2184_v52, %v499_v51  ;;  %v491_v55 = vadd.f32 %v490_v53, %v397_v43  ;;  %v585_v56 = vpop.f32.mrf.mxu1 }
  0xec   :  { %v586_v57 = vadd.f32 %v585_v56, %v491_v55 }
  0xed   :  { %v2179_v58 = vpop.f32.mrf.mxu0 }
  0xee   :  { %v515_v59 = vadd.f32 %v2179_v58, %v418_v47  ;;  %v2187_v60 = vpop.f32.mrf.mxu1 }
  0xef   :  { %v506_v61 = vpop.f32.mrf.mxu0 }
  0xf0   :  { %v2761_v62 = vadd.f32 %v2187_v60, %v515_v59  ;;  %v507_v63 = vadd.f32 %v506_v61, %v411_v50  ;;  %v597_v2 = vpop.f32.mrf.mxu1 }
  0xf2   :  { %v598_v4 = vadd.f32 %v597_v2, %v507_v63 }
  0xf3   :  { %v2198_v5 = vpop.f32.mrf.mxu0 }
  0xf4   :  { %v2763_v7 = vadd.f32 %v2198_v5, %v592_v54  ;;  %v2212_v9 = vpop.f32.mrf.mxu1 }
  0xf5   :  { %v674_v3 = vpop.f32.mrf.mxu0 }
  0xf6   :  { %v2765_v6 = vadd.f32 %v674_v3, %v586_v57  ;;  %v783_v10 = vpop.f32.mrf.mxu1 }
  0xf7   :  { %v2767_v11 = vpop.f32.mrf.mxu0 }
  0xf8   :  { %v2215_v13 = vpop.f32.mrf.mxu1 }
  0xf9   :  { %v686_v8 = vpop.f32.mrf.mxu0 }
  0xfa   :  { %v2769_v14 = vadd.f32 %v686_v8, %v598_v4  ;;  %v803_v12 = vpop.f32.mrf.mxu1 }
  0xfb   :  { %v2220_v15 = vpop.f32.mrf.mxu0 }
  0xfc   :  { %v2228_v16 = vpop.f32.mrf.mxu1  ;;  %v891_v46 = vadd.f32 %v2220_v15, %v2212_v9 }
  0xfd   :  { %v884_v17 = vpop.f32.mrf.mxu0 }
  0xfe   :  { %v974_v18 = vpop.f32.mrf.mxu1  ;;  %v885_v51 = vadd.f32 %v884_v17, %v783_v10  ;;  %v982_v57 = vadd.f32 %v2228_v16, %v891_v46 }
 0x100   :  { %v2223_v19 = vpop.f32.mrf.mxu0  ;;  %v2231_v20 = vpop.f32.mrf.mxu1  ;;  %v975_v61 = vadd.f32 %v974_v18, %v885_v51  ;;  %v1871_v51 = vld [vmem:[%s2820_s2 + $0x18] sm:$0xff] }
 0x101   :  { %v903_v47 = vadd.f32 %v2223_v19, %v2215_v13  ;;  %vm1895_vm4 = vcmp.gt.f32.partialorder %v1871_v51, 0.5  ;;  %vm1916_vm5 = vcmp.lt.f32.partialorder %v1871_v51, -0.5 }
 0x102   :  { %v896_v21 = vpop.f32.mrf.mxu0  ;;  %v988_v22 = vpop.f32.mrf.mxu1 }
 0x103   :  { %v897_v52 = vadd.f32 %v896_v21, %v803_v12  ;;  %v996_v58 = vadd.f32 %v2231_v20, %v903_v47 }
 0x104   :  { %v2242_v23 = vpop.f32.mrf.mxu0 }
 0x105   :  { %v2250_v24 = vpop.f32.mrf.mxu1  ;;  %v989_v63 = vadd.f32 %v988_v22, %v897_v52  ;;  %v1077_v2 = vadd.f32 %v2242_v23, %v982_v57 }
 0x106   :  { %v1068_v25 = vpop.f32.mrf.mxu0 }
 0x107   :  { %v1163_v26 = vpop.f32.mrf.mxu1  ;;  %v1069_v10 = vadd.f32 %v1068_v25, %v975_v61  ;;  %v1170_v20 = vadd.f32 %v2250_v24, %v1077_v2 }
 0x109   :  { %v1164_v22 = vadd.f32 %v1163_v26, %v1069_v10 }
 0x10a   :  { %v2245_v27 = vpop.f32.mrf.mxu0  ;;  %v2253_v28 = vpop.f32.mrf.mxu1 }
 0x10b   :  { %v1093_v4 = vadd.f32 %v2245_v27, %v996_v58 }
 0x10c   :  { %v1084_v29 = vpop.f32.mrf.mxu0  ;;  %v1175_v30 = vpop.f32.mrf.mxu1 }
 0x10d   :  { %v1085_v12 = vadd.f32 %v1084_v29, %v989_v63 }
 0x10f   :  { %v1176_v23 = vadd.f32 %v1175_v30, %v1085_v12 }
 0x110   :  { %v2264_v31 = vpop.f32.mrf.mxu0  ;;  %v2278_v1 = vpop.f32.mrf.mxu1 }
 0x111   :  { %v1259_v27 = vadd.f32 %v2264_v31, %v1170_v20 }
 0x112   :  { %v1252_v32 = vpop.f32.mrf.mxu0  ;;  %v1361_v33 = vpop.f32.mrf.mxu1 }
 0x113   :  { %v1253_v25 = vadd.f32 %v1252_v32, %v1164_v22  ;;  %v693_v32 = vadd.f32 %v2767_v11, %v2761_v62  ;;  %v1870_v11 = vld [vmem:[%s2820_s2 + $0x10] sm:$0xff] }
 0x114   :  { %v2267_v34 = vpop.f32.mrf.mxu0  ;;  %v2281_v35 = vpop.f32.mrf.mxu1  ;;  %vm1894_vm8 = vcmp.gt.f32.partialorder %v1870_v11, 0.5  ;;  %vm1915_vm9 = vcmp.lt.f32.partialorder %v1870_v11, -0.5 }
 0x116   :  { %v1264_v36 = vpop.f32.mrf.mxu0  ;;  %v1381_v37 = vpop.f32.mrf.mxu1 }
 0x117   :  { %v1265_v29 = vadd.f32 %v1264_v36, %v1176_v23  ;;  %v1869_v36 = vld [vmem:[%s2820_s2 + $0x8] sm:$0xff] }
 0x118   :  { %v2286_v38 = vpop.f32.mrf.mxu0  ;;  %v2294_v39 = vpop.f32.mrf.mxu1  ;;  %vm1893_vm2 = vcmp.gt.f32.partialorder %v1869_v36, 0.5  ;;  %vm1914_vm3 = vcmp.lt.f32.partialorder %v1869_v36, -0.5 }
 0x119   :  { %v1469_v49 = vadd.f32 %v2286_v38, %v2278_v1 }
 0x11a   :  { %v1462_v40 = vpop.f32.mrf.mxu0  ;;  %v1552_v41 = vpop.f32.mrf.mxu1 }
 0x11b   :  { %v1463_v54 = vadd.f32 %v1462_v40, %v1361_v33  ;;  %v1560_v59 = vadd.f32 %v2294_v39, %v1469_v49  ;;  %v1182_v33 = vadd.f32 %v2253_v28, %v1093_v4 }
 0x11c   :  { %v2289_v42 = vpop.f32.mrf.mxu0 }
 0x11d   :  { %v2297_v43 = vpop.f32.mrf.mxu1  ;;  %v1481_v0 = vadd.f32 %v2289_v42, %v2281_v35  ;;  %v1553_v9 = vadd.f32 %v1552_v41, %v1463_v54  ;;  %v1271_v39 = vadd.f32 %v2267_v34, %v1182_v33  ;;  %v1868_v54 = vld [vmem:[%s2820_s2] sm:$0xff]  ;;  %s2432_s2 = smov [#allocation7]  }
 0x11e   :  { %v1474_v44 = vpop.f32.mrf.mxu0  ;;  %vm1892_vm6 = vcmp.gt.f32.partialorder %v1868_v54, 0.5  ;;  %vm1913_vm7 = vcmp.lt.f32.partialorder %v1868_v54, -0.5  ;;  %s1982_s10 = sshll.u32 %s2432_s2, 4  ;;  %s1983_s10 = int_to_ptr.vmem [resolvable:$true] %s1982_s10 }
 0x11f   :  { %v1566_v45 = vpop.f32.mrf.mxu1  ;;  %v1475_v55 = vadd.f32 %v1474_v44, %v1381_v37  ;;  %v1574_v60 = vadd.f32 %v2297_v43, %v1481_v0  ;;  %s2381_s14 = scalar_lea.vmem %s1983_s10, 128  ;;  %p2386_p6 = scmp.lt.s32.totalorder %s1983_s10, %s1983_s10 }
 0x120   :  { %v2308_v48 = vpop.f32.mrf.mxu0  ;;  %p2382_p5 = scmp.ne.s32.totalorder %s1983_s10, %s2381_s14  ;;  %p2387_p7 = scmp.lt.s32.totalorder %s2381_s14, %s2381_s14 }
 0x121   :  { %v2316_v50 = vpop.f32.mrf.mxu1  ;;  %v1567_v3 = vadd.f32 %v1566_v45, %v1475_v55  ;;  %v1655_v13 = vadd.f32 %v2308_v48, %v1560_v59 }
 0x122   :  { %v1646_v53 = vpop.f32.mrf.mxu0  ;;  %p2388_p8 = por %p2387_p7, %p2386_p6 }
 0x123   :  { %v1741_v56 = vpop.f32.mrf.mxu1  ;;  %v1647_v19 = vadd.f32 %v1646_v53, %v1553_v9  ;;  %v1748_v35 = vadd.f32 %v2316_v50, %v1655_v13 }
 0x124   :  { %p2389_p9 = pnand %p2388_p8, %p2382_p5 }
 0x125   :  { %v1742_v40 = vadd.f32 %v1741_v56, %v1647_v19 }
 0x126   :  { %v2311_v5 = vpop.f32.mrf.mxu0 }
 0x127   :  { %v1671_v8 = vadd.f32 %v2311_v5, %v1574_v60  ;;  %v2319_v15 = vpop.f32.mrf.mxu1 }
 0x128   :  { %v1662_v17 = vpop.f32.mrf.mxu0 }
 0x129   :  { %v1760_v21 = vadd.f32 %v2319_v15, %v1671_v8  ;;  %v1663_v1 = vadd.f32 %v1662_v17, %v1567_v3  ;;  %v1753_v16 = vpop.f32.mrf.mxu1  ;;  %v1910_v3 = vld [vmem:[#allocation3 + $0x8] sm:$0xff]  ;;  %v1891_v15 = vld [vmem:[#allocation2 + $0x18] sm:$0xff] }
 0x12b   :  { %v1754_v18 = vadd.f32 %v1753_v16, %v1663_v1  ;;  %v1909_v1 = vld [vmem:[#allocation3] sm:$0xff] }
 0x12c   :  { %v2330_v37 = vpop.f32.mrf.mxu0  ;;  %v2333_v38 = vpop.f32.mrf.mxu1 }
 0x12d   :  { %v1837_v41 = vadd.f32 %v2330_v37, %v1748_v35  ;;  %v1849_v42 = vadd.f32 %v2333_v38, %v1760_v21  ;;  %v1888_v21 = vld [vmem:[#allocation2] sm:$0xff] }
 0x12e   :  { %v1830_v43 = vpop.f32.mrf.mxu0  ;;  %v1842_v44 = vpop.f32.mrf.mxu1 }
 0x12f   :  { %v1853_v45 = vmul.f32 %v1837_v41, %v1259_v27  ;;  %v1855_v46 = vmul.f32 %v1849_v42, %v1271_v39  ;;  %v1831_v47 = vadd.f32 %v1830_v43, %v1742_v40  ;;  %v1843_v24 = vadd.f32 %v1842_v44, %v1754_v18  ;;  %v1890_v40 = vld [vmem:[#allocation2 + $0x10] sm:$0xff] }
 0x130   :  { %v1911_v41 = vld [vmem:[#allocation3 + $0x10] sm:$0xff] }
 0x131   :  { %v1857_v28 = vmax.f32 %v1853_v45, 1e-16  ;;  %v1859_v48 = vmax.f32 %v1855_v46, 1e-16  ;;  %v1852_v49 = vmul.f32 %v1831_v47, %v1253_v25  ;;  %v1854_v26 = vmul.f32 %v1843_v24, %v1265_v29 }
 0x133   :  { %2353 = vrsqrt.f32 %v1857_v28  ;;  %v1856_v30 = vmax.f32 %v1852_v49, 1e-16  ;;  %v1858_v31 = vmax.f32 %v1854_v26, 1e-16 }
 0x134   :  { %2355 = vrsqrt.f32 %v1859_v48 }
 0x135   :  { %2357 = vrsqrt.f32 %v1856_v30 }
 0x136   :  { %2359 = vrsqrt.f32 %v1858_v31 }
 0x140   :  { %v2354_v34 = vpop.eup %2353 }
 0x141   :  { %v2356_v0 = vpop.eup %2355  ;;  %v1865_v50 = vmul.f32 %v2354_v34, %v2763_v7 }
 0x142   :  { %v2358_v52 = vpop.eup %2357  ;;  %v1867_v53 = vmul.f32 %v2356_v0, %v693_v32 }
 0x143   :  { %v2360_v55 = vpop.eup %2359  ;;  %v1873_v56 = vmul.f32 %v1869_v36, %v1865_v50  ;;  %v1864_v62 = vmul.f32 %v2358_v52, %v2765_v6  ;;  %v1889_v6 = vld [vmem:[#allocation2 + $0x8] sm:$0xff] }
 0x144   :  { %v1875_v57 = vmul.f32 %v1871_v51, %v1867_v53  ;;  %v1866_v7 = vmul.f32 %v2360_v55, %v2769_v14  ;;  %v1912_v14 = vld [vmem:[#allocation3 + $0x18] sm:$0xff] }
 0x145   :  { %v1877_v58 = vsub.f32 0.5, %v1873_v56  ;;  %v1872_v59 = vmul.f32 %v1868_v54, %v1864_v62 }
 0x146   :  { %v1879_v60 = vsub.f32 0.5, %v1875_v57  ;;  %v1874_v61 = vmul.f32 %v1870_v11, %v1866_v7 }
 0x147   :  { %v1881_v63 = vmax.f32 %v1877_v58, 0.0  ;;  %v1876_v2 = vsub.f32 0.5, %v1872_v59 }
 0x148   :  { %v1883_v4 = vmax.f32 %v1879_v60, 0.0  ;;  %v1878_v5 = vsub.f32 0.5, %v1874_v61 }
 0x149   :  { %v1885_v9 = vmul.f32 %v1881_v63, %v1881_v63  ;;  %v1880_v13 = vmax.f32 %v1876_v2, 0.0 }
 0x14a   :  { %v1887_v8 = vmul.f32 %v1883_v4, %v1883_v4  ;;  %v1882_v10 = vmax.f32 %v1878_v5, 0.0 }
 0x14b   :  { %v1897_v12 = vsel %vm1893_vm2, %v1885_v9, 0.0  ;;  %v1918_v17 = vsel %vm1914_vm3, %v1885_v9, 0.0  ;;  %v1884_v19 = vmul.f32 %v1880_v13, %v1880_v13 }
 0x14c   :  { %v1901_v16 = vadd.f32 %v1897_v12, %v1889_v6  ;;  %v1922_v20 = vadd.f32 %v1918_v17, %v1910_v3  ;;  %v1899_v33 = vsel %vm1895_vm4, %v1887_v8, 0.0  ;;  %v1920_v35 = vsel %vm1916_vm5, %v1887_v8, 0.0 }
 0x14d   :  { %v1903_v18 = vadd.f32 %v1899_v33, %v1891_v15  ;;  %v1924_v22 = vadd.f32 %v1920_v35, %v1912_v14  ;;  %v1896_v23 = vsel %vm1892_vm6, %v1884_v19, 0.0  ;;  %v1917_v27 = vsel %vm1913_vm7, %v1884_v19, 0.0 }
 0x14e   :  { %1906 = vst.msk [vmem:[#allocation2 + $0x8] sm:$0xff] %vm100_vm1, %v1901_v16  ;;  %1926 = vst.msk [vmem:[#allocation3 + $0x8] sm:$0xff] %vm100_vm1, %v1922_v20  ;;  %v1900_v37 = vadd.f32 %v1896_v23, %v1888_v21  ;;  %v1921_v38 = vadd.f32 %v1917_v27, %v1909_v1  ;;  %v1886_v39 = vmul.f32 %v1882_v10, %v1882_v10 }
 0x14f   :  { %1908 = vst.msk [vmem:[#allocation2 + $0x18] sm:$0xff] %vm100_vm1, %v1903_v18  ;;  %1928 = vst.msk [vmem:[#allocation3 + $0x18] sm:$0xff] %vm100_vm1, %v1924_v22 }
 0x150   :  { %1905 = vst.msk [vmem:[#allocation2] sm:$0xff] %vm100_vm1, %v1900_v37  ;;  %1925 = vst.msk [vmem:[#allocation3] sm:$0xff] %vm100_vm1, %v1921_v38  ;;  %v1898_v42 = vsel %vm1894_vm8, %v1886_v39, 0.0  ;;  %v1919_v25 = vsel %vm1915_vm9, %v1886_v39, 0.0 }
 0x151   :  { %v1902_v29 = vadd.f32 %v1898_v42, %v1890_v40  ;;  %v1923_v43 = vadd.f32 %v1919_v25, %v1911_v41 }
 0x153   :  { %1907 = vst.msk [vmem:[#allocation2 + $0x10] sm:$0xff] %vm100_vm1, %v1902_v29  ;;  %1927 = vst.msk [vmem:[#allocation3 + $0x10] sm:$0xff] %vm100_vm1, %v1923_v43 }
 0x155   :  { %v1933_v44 = vld [vmem:[#allocation2 + $0x8] sm:$0xff] }
 0x156   :  { %v1955_v45 = vld [vmem:[#allocation3 + $0x8] sm:$0xff]  ;;  %v1937_v28 = vsel %vm100_vm1, %v1933_v44, 0.0  ;;  %v1935_v31 = vld [vmem:[#allocation2 + $0x18] sm:$0xff] }
 0x157   :  { %v1932_v46 = vld [vmem:[#allocation2] sm:$0xff]  ;;  %v1959_v26 = vsel %vm100_vm1, %v1955_v45, 0.0  ;;  %v1941_v50 = vsel %vm100_vm1, %v1935_v31, 0.0  ;;  %v1957_v53 = vld [vmem:[#allocation3 + $0x18] sm:$0xff] }
 0x158   :  { %v1954_v47 = vld [vmem:[#allocation3] sm:$0xff]  ;;  %v1936_v24 = vsel %vm100_vm1, %v1932_v46, 0.0  ;;  %v1963_v55 = vsel %vm100_vm1, %v1957_v53, 0.0 }
 0x159   :  { %v1958_v48 = vsel %vm100_vm1, %v1954_v47, 0.0  ;;  %v1938_v49 = vadd.f32 %v1937_v28, %v1936_v24 }
 0x15a   :  { %v1934_v30 = vld [vmem:[#allocation2 + $0x10] sm:$0xff]  ;;  %v1960_v32 = vadd.f32 %v1959_v26, %v1958_v48 }
 0x15b   :  { %v1956_v34 = vld [vmem:[#allocation3 + $0x10] sm:$0xff]  ;;  %v1939_v36 = vsel %vm100_vm1, %v1934_v30, 0.0 }
 0x15c   :  { %v1940_v0 = vadd.f32 %v1939_v36, %v1938_v49  ;;  %v1961_v51 = vsel %vm100_vm1, %v1956_v34, 0.0 }
 0x15d   :  { %v1962_v54 = vadd.f32 %v1961_v51, %v1960_v32 }
 0x15e   :  { %v1942_v52 = vadd.f32 %v1941_v50, %v1940_v0 }
 0x15f   :  { %v1964_v56 = vadd.f32 %v1963_v55, %v1962_v54 }
 0x160   :  { %1943 = vadd.xlane.f32.xlu0 %v1942_v52 }
 0x164   :  { %1965 = vadd.xlane.f32.xlu0 %v1964_v56 }
 0x1e9   :  { %v1944_v62 = vpop.xlane.xlu0 %1943 }
 0x1ea   :  { %v1945_v11 = vrot.slane %v1944_v62, 4 }
 0x1ec   :  { %v1946_v57 = vadd.f32 %v1945_v11, %v1944_v62 }
 0x1ed   :  { %v1966_v7 = vpop.xlane.xlu0 %1965 }
 0x1ee   :  { %v1947_v58 = vrot.slane %v1946_v57, 2  ;;  %v1967_v59 = vrot.slane %v1966_v7, 4 }
 0x1f0   :  { %v1968_v60 = vadd.f32 %v1967_v59, %v1966_v7  ;;  %v1948_v61 = vadd.f32 %v1947_v58, %v1946_v57 }
 0x1f2   :  { %v1969_v63 = vrot.slane %v1968_v60, 2  ;;  %v1949_v2 = vrot.slane %v1948_v61, 1 }
 0x1f4   :  { %v1970_v4 = vadd.f32 %v1969_v63, %v1968_v60  ;;  %v1950_v5 = vadd.f32 %v1949_v2, %v1948_v61 }
 0x1f6   :  { %2342 = vpush %v1950_v5  ;;  %v1971_v9 = vrot.slane %v1970_v4, 1 }
 0x1f8   :  { %v1972_v6 = vadd.f32 %v1971_v9, %v1970_v4 }
 0x1fa   :  { %2344 = vpush %v1972_v6 }
 0x227   :  { %s2343_s11 = spop %2342 }
 0x228   :  { %v1952_v3 = vstv %s2343_s11 }
 0x229   :  { %1953 = vst [vmem:[#allocation7] sm:$0xff] %v1952_v3 }
 0x22a   :  { %2392 = shalt.err (!%p2389_p9)
}
 0x22b   :  { %1985 = dma.vmem_to_hbm [thread:$0]  %s1983_s10, 128, %s2821_s3, [#allocation6]  }
 0x22c   :  { %s2345_s17 = spop %2344  ;;  %s2401_s18 = scalar_lea.vmem %s1993_s13, 128 }
 0x22d   :  { %v1974_v13 = vstv %s2345_s17  ;;  %p2402_p10 = scmp.ne.s32.totalorder %s1993_s13, %s2401_s18  ;;  %p2406_p11 = scmp.lt.s32.totalorder %s1993_s13, %s1993_s13 }
 0x22e   :  { %1975 = vst [vmem:[#allocation8] sm:$0xff] %v1974_v13  ;;  %p2407_p12 = scmp.lt.s32.totalorder %s2401_s18, %s2401_s18 }
 0x230   :  { %p2408_p13 = por %p2407_p12, %p2406_p11 }
 0x232   :  { %p2409_p0 = pnand %p2408_p13, %p2402_p10 }
 0x234   :  { %2412 = shalt.err (!%p2409_p0)
}
 0x235   :  { %1995 = dma.vmem_to_hbm [thread:$0]  %s1993_s13, 128, %s2822_s4, [#allocation9]  }
 0x236   :  { %2423 = dma.done.wait [#allocation6], 128  }
 0x237   :  { %2424 = vsyncadd [#allocation6], 4294967168 }
 0x238   :  { %2425 = dma.done.wait [#allocation9], 128  }
 0x239   :  { %2426 = vsyncadd [#allocation9], 4294967168 }
 0x23a   :  { %2002 = vsyncpa [#allocation5], 1 }
 0x23b   :  { %2003 = vsyncpa [#allocation6], 1 }
 0x23c   :  { %2004 = vsyncpa [#allocation9], 1 }

</bundles_post_ra>
